<compile_context>
chip_gen: v7x
topology: tpu7x:2x2x1
jax: 0.10.0
libtpu: 0.0.40
codegen_flags: <defaults>
</compile_context>

<pallas_src>
import jax
import jax.numpy as jnp
from jax.experimental import pallas as pl
from jax.experimental.pallas import tpu as pltpu


def _patch_embed_kernel(x_ref, w_ref, b_ref, o_ref):
    # x_ref: (tm, Kp) patch tile; w_ref: (Kp, Np) resident weight; b_ref: (1, Np) f32.
    # Default MXU precision (matches the conv reference).  Pass
    # precision=jax.lax.Precision.HIGHEST here if strict f32 parity is needed
    # (~3-6x MXU cost).
    acc = jnp.dot(x_ref[...], w_ref[...], preferred_element_type=jnp.float32)
    o_ref[...] = (acc + b_ref[...]).astype(o_ref.dtype)


def _round_up(x, m):
    return ((x + m - 1) // m) * m


def _vmem_capacity_bytes():
    try:
        cap = getattr(pltpu.get_tpu_info(), "vmem_capacity_bytes", None)
        if cap:
            return int(cap)
    except Exception:
        pass
    return 64 * 1024 * 1024  # conservative (v7x-sized) fallback


def patch_embed(x, weight, bias, patch_size, compute_dtype=None, out_dtype=None):
    """x: (B, C, H, W) NCHW. weight: (E, C, ph, pw). bias: (E,).

    Returns (B, num_patches, E).  compute_dtype=bf16 is recommended on
    v5e/v6e/v7x for this memory-bound op; out_dtype defaults to x.dtype.
    """
    B, C, H, W = x.shape
    ph, pw = patch_size
    E = weight.shape[0]
    assert H % ph == 0 and W % pw == 0, "spatial dims must be divisible by patch size"
    Hp, Wp = H // ph, W // pw
    num_patches = Hp * Wp
    K = C * ph * pw
    M = B * num_patches

    if compute_dtype is None:
        compute_dtype = x.dtype
    if out_dtype is None:
        out_dtype = x.dtype
    cbytes = jnp.dtype(compute_dtype).itemsize
    obytes = jnp.dtype(out_dtype).itemsize

    # --- glue (fused under jit): cast, patch extraction, K/N zero padding ---
    # Per-patch feature order (c, u, v) matches the flattened Conv2d weight.
    patches = x.astype(compute_dtype).reshape(B, C, Hp, ph, Wp, pw)
    patches = jnp.transpose(patches, (0, 2, 4, 1, 3, 5))   # (B, Hp, Wp, C, ph, pw)
    patches = patches.reshape(M, K)

    w_mat = jnp.transpose(weight.reshape(E, K)).astype(compute_dtype)   # (K, E)
    b_mat = bias.reshape(1, E).astype(jnp.float32)                      # bias add in f32

    # Lane-dense padding: contraction and output dims up to multiples of 128.
    Kp = _round_up(K, 128)
    Np = _round_up(E, 128)
    if Kp != K:
        # Zero K columns so OOB/garbage lanes cannot inject NaN/Inf into real rows.
        patches = jnp.pad(patches, ((0, 0), (0, Kp - K)))
    w_pad = jnp.pad(w_mat, ((0, Kp - K), (0, Np - E)))
    b_pad = jnp.pad(b_mat, ((0, 0), (0, Np - E)))

    # --- M tile selection ---
    sub = {1: 32, 2: 16, 4: 8}.get(cbytes, 8)        # dtype-correct sublane multiple
    tm_cap = 1024 if cbytes <= 2 else 512
    if M >= 2 * sub:
        # Guarantee >= 2 grid steps so both v7x TensorCores get work and the
        # pipeline can overlap DMA with compute.
        tm = min(tm_cap, _round_up(pl.cdiv(M, 2), sub))
    else:
        tm = _round_up(max(M, 1), sub)

    def _vmem_needed(t):
        return (2 * t * Kp * cbytes          # double-buffered input tile
                + Kp * Np * cbytes           # weight (Buffered(1), index-invariant)
                + Np * 4                     # bias   (Buffered(1))
                + t * Np * 4                 # f32 accumulator before astype
                + 2 * t * Np * obytes)       # double-buffered output tile

    # Per-generation budget: wide tiles on 128-MiB VMEM chips, tighter on v7x.
    if _vmem_capacity_bytes() >= 96 * 1024 * 1024:   # v5e / v6e
        budget, vmem_limit = 48 * 1024 * 1024, 64 * 1024 * 1024
    else:                                            # v7x (64 MiB physical)
        budget, vmem_limit = 26 * 1024 * 1024, 40 * 1024 * 1024
    while tm > sub and _vmem_needed(tm) > budget:
        tm = max(sub, _round_up(tm // 2, sub))

    grid_m = pl.cdiv(M, tm)

    cost = pl.CostEstimate(
        flops=2 * M * Kp * Np,
        transcendentals=0,
        bytes_accessed=M * Kp * cbytes + Kp * Np * cbytes + Np * 4 + M * Np * obytes,
    )

    out = pl.pallas_call(
        _patch_embed_kernel,
        out_shape=jax.ShapeDtypeStruct((M, Np), out_dtype),
        grid_spec=pltpu.PrefetchScalarGridSpec(
            num_scalar_prefetch=0,
            grid=(grid_m,),
            in_specs=[
                pl.BlockSpec((tm, Kp), lambda i: (i, 0)),
                pl.BlockSpec((Kp, Np), lambda i: (0, 0),
                             pipeline_mode=pl.Buffered(1)),
                pl.BlockSpec((1, Np), lambda i: (0, 0),
                             pipeline_mode=pl.Buffered(1)),
            ],
            out_specs=pl.BlockSpec((tm, Np), lambda i: (i, 0)),
        ),
        compiler_params=pltpu.CompilerParams(
            dimension_semantics=("parallel",),
            vmem_limit_bytes=vmem_limit,
        ),
        cost_estimate=cost,
    )(patches, w_pad, b_pad)

    if Np != E:
        out = out[:, :E]
    return out.reshape(B, num_patches, E)


def reference_patch_embed(x, weight, bias, patch_size):
    """Pure-JAX reference mirroring nn.Conv2d(stride=kernel)+flatten+transpose."""
    out = jax.lax.conv_general_dilated(
        x, weight, window_strides=patch_size, padding="VALID",
        dimension_numbers=("NCHW", "OIHW", "NCHW"))
    out = out + bias.reshape(1, -1, 1, 1)
    B, E, Hp, Wp = out.shape
    return jnp.transpose(out.reshape(B, E, Hp * Wp), (0, 2, 1))


if __name__ == "__main__":
    # Small shapes consistent with the module: img_size=16, patch_size=4,
    # in_chans=4, embed_dim=32  ->  num_patches = 16, K = 64.
    B, C, H, W = 2, 4, 16, 16
    ph, pw = 4, 4
    E = 32

    key = jax.random.PRNGKey(0)
    kx, kw, kb = jax.random.split(key, 3)
    x = jax.random.normal(kx, (B, C, H, W), dtype=jnp.float32)
    fan_in = C * ph * pw
    weight = jax.random.normal(kw, (E, C, ph, pw), dtype=jnp.float32) / jnp.sqrt(fan_in)
    bias = jax.random.normal(kb, (E,), dtype=jnp.float32) * 0.01

    fn = jax.jit(patch_embed, static_argnames=("patch_size", "compute_dtype", "out_dtype"))

    # f32 operands: check against the conv reference.
    out = jax.block_until_ready(fn(x, weight, bias, patch_size=(ph, pw)))
    ref = reference_patch_embed(x, weight, bias, (ph, pw))
    assert out.shape == (B, (H // ph) * (W // pw), E), out.shape
    assert jnp.allclose(out, ref, atol=1e-4, rtol=1e-4), "f32 mismatch vs reference"

    # bf16 matmul operands (recommended on v5e/v6e/v7x), f32 accumulation + bias.
    out_bf16 = jax.block_until_ready(
        fn(x, weight, bias, patch_size=(ph, pw), compute_dtype=jnp.bfloat16))
    assert out_bf16.shape == out.shape
    assert jnp.allclose(out_bf16, ref, atol=5e-2, rtol=5e-2), "bf16 mismatch vs reference"

    # bf16 output path (downstream-bf16 models): halves the output HBM stream.
    out_bo = jax.block_until_ready(
        fn(x, weight, bias, patch_size=(ph, pw),
           compute_dtype=jnp.bfloat16, out_dtype=jnp.bfloat16))
    assert out_bo.dtype == jnp.bfloat16 and out_bo.shape == out.shape
    assert jnp.allclose(out_bo.astype(jnp.float32), ref, atol=5e-2, rtol=5e-2)

    print("KERNEL_OK")
</pallas_src>

<mosaic_0001>
module attributes {stable_mosaic.version = 11 : i64} {
  func.func @_patch_embed_kernel(%arg0: i32, %arg1: memref<16x128xf32, #tpu.memory_space<vmem>>, %arg2: memref<128x128xf32, #tpu.memory_space<vmem>>, %arg3: memref<1x128xf32, #tpu.memory_space<vmem>>, %arg4: memref<16x128xf32, #tpu.memory_space<vmem>>) attributes {dimension_semantics = [#tpu.dimension_semantics<parallel>], iteration_bounds = array<i64: 2>, scalar_prefetch = 0 : i64, scratch_operands = 0 : i64, tpu.core_type = #tpu.core_type<tc>, window_params = [{transform_indices = @transform_0, window_bounds = array<i64: 16, 128>}, {pipeline_mode = #tpu.pipeline_mode<synchronous>, transform_indices = @transform_1, window_bounds = array<i64: 128, 128>}, {pipeline_mode = #tpu.pipeline_mode<synchronous>, transform_indices = @transform_2, window_bounds = array<i64: 1, 128>}, {transform_indices = @transform_3, window_bounds = array<i64: 16, 128>}]} {
    %c0 = arith.constant 0 : index
    %c0_0 = arith.constant 0 : index
    %0 = vector.load %arg1[%c0, %c0_0] : memref<16x128xf32, #tpu.memory_space<vmem>>, vector<16x128xf32>
    %c0_1 = arith.constant 0 : index
    %c0_2 = arith.constant 0 : index
    %1 = vector.load %arg2[%c0_1, %c0_2] : memref<128x128xf32, #tpu.memory_space<vmem>>, vector<128x128xf32>
    %cst = arith.constant dense<0.000000e+00> : vector<16x128xf32>
    %2 = tpu.matmul %0, %1, %cst {dimension_numbers = #tpu.dot_dimension_numbers<[1], [0], [0], [1], [0, 0, 1, 1], [], []>} : vector<16x128xf32>, vector<128x128xf32>, vector<16x128xf32> -> vector<16x128xf32>
    %c0_3 = arith.constant 0 : index
    %c0_4 = arith.constant 0 : index
    %3 = vector.load %arg3[%c0_3, %c0_4] : memref<1x128xf32, #tpu.memory_space<vmem>>, vector<1x128xf32>
    %4 = vector.broadcast %3 : vector<1x128xf32> to vector<16x128xf32>
    %5 = arith.addf %2, %4 : vector<16x128xf32>
    %c0_5 = arith.constant 0 : index
    %c0_6 = arith.constant 0 : index
    %6 = vector.load %arg4[%c0_5, %c0_6] : memref<16x128xf32, #tpu.memory_space<vmem>>, vector<16x128xf32>
    tpu.vector_store %arg4[%c0_5, %c0_6], %5 {strides = array<i32>} : memref<16x128xf32, #tpu.memory_space<vmem>>, vector<16x128xf32>,
    return
  }
  func.func @transform_0(%arg0: i32) -> (i32, i32) {
    %c0_i32 = arith.constant 0 : i32
    %c0_i32_0 = arith.constant 0 : i32
    return %arg0, %c0_i32 : i32, i32
  }
  func.func @transform_1(%arg0: i32) -> (i32, i32) {
    %c0_i32 = arith.constant 0 : i32
    %c0_i32_0 = arith.constant 0 : i32
    %c0_i32_1 = arith.constant 0 : i32
    return %c0_i32, %c0_i32_0 : i32, i32
  }
  func.func @transform_2(%arg0: i32) -> (i32, i32) {
    %c0_i32 = arith.constant 0 : i32
    %c0_i32_0 = arith.constant 0 : i32
    %c0_i32_1 = arith.constant 0 : i32
    return %c0_i32, %c0_i32_0 : i32, i32
  }
  func.func @transform_3(%arg0: i32) -> (i32, i32) {
    %c0_i32 = arith.constant 0 : i32
    %c0_i32_0 = arith.constant 0 : i32
    return %arg0, %c0_i32 : i32, i32
  }
}

</mosaic_0001>

<bundles_post_ra>
// kernel: patch_embed.1
= control target key start
LH: loop header
LB: loop body
LE: loop exit
PB: predicated region body
PF: predicated region fallthrough
CT: control target
= control target key end

     0   :  { %8 = vsyncpa [#allocation3], 0  ;;  %s730_s0 = inlined_call_operand.vmem [shape: f32[32,128], index: 0, kind: input, shape index: {}]   ;;  %s731_s1 = inlined_call_operand.vmem [shape: f32[128,128], index: 1, kind: input, shape index: {}]   ;;  %s732_s2 = inlined_call_operand.vmem [shape: f32[1,128], index: 2, kind: input, shape index: {}]   ;;  %s733_s3 = inlined_call_operand.hbm [shape: f32[32,128], index: 3, kind: output, shape index: {}]  }
   0x1   :  { %10 = vsyncpa [#allocation3 + $0x1], 0  ;;  %s577_s12 = smov 0   ;;  %s579_s13 = smov 0  }
   0x2   :  { %s581_s14 = smov 0   ;;  %s583_s15 = smov 0  }
   0x3 LB: > { %s598_s16 = sadd.s32 4294967295, %s552_s15   ;;  %s350_s17 = sadd.s32 4294967294, %s552_s15   ;;  %s552_s15 = sphi %s583_s15, %s739_s15   ;;  %s548_s14 = sphi %s581_s14, %s738_s14   ;;  %s544_s13 = sphi %s579_s13, %s737_s13   ;;  %s540_s12 = sphi %s577_s12, %s736_s12  }
   0x4   : > { %s602_s18 = sadd.s32 1, %s552_s15   ;;  %s91_s19 = sadd.s32 1, %s548_s14 }
   0x5   : > { %s88_s20 = ssub.s32 %s552_s15, %s602_s18  ;;  %p101_p0 = scmp.ne.s32.totalorder %s548_s14, %s544_s13 }
   0x6   : > { %p89_p1 = scmp.eq.s32.totalorder %s88_s20, 0  ;;  %p102_p2 = scmp.eq.s32.totalorder %s598_s16, 1 }
   0x7   : > { %p107_p3 = scmp.ne.s32.totalorder %s544_s13, %s540_s12  ;;  %p108_p4 = scmp.eq.s32.totalorder %s350_s17, 1 }
   0x8   : > { %s613_s21 = scalar_select %p89_p1, %s548_s14, %s91_s19  }
   0x9   : > { %p615_p5 = por %p102_p2, %p101_p0  ;;  %p619_p6 = por %p108_p4, %p107_p3 }
   0xa   : > { %p353_p7 = scmp.ge.s32.totalorder %s552_s15, 1  ;;  %p141_p8 = scmp.lt.s32.totalorder %s552_s15, 3 }
   0xc   : > { %p142_p9 = pnand %p353_p7, %p141_p8 }
   0xd   : > { %v174_v0 = vld [vmem:[%s731_s1] sm:$0xff] (!%p142_p9)  ;;  %v175_v1 = vld [vmem:[%s731_s1 + $0x8] sm:$0xff] (!%p142_p9)  ;;  %v176_v2 = vld [vmem:[%s731_s1 + $0x10] sm:$0xff] (!%p142_p9)  ;;  %s355_s30 = sshll.u32 (!%p142_p9), %s598_s16, 1  ;;  %s162_s25 = sand.u32 (!%p142_p9), 1, %s544_s13  }
   0xe   : > { %145 = sbr.rel (%p142_p9) target bundleno = 278 (0x116), region = 32  ;;  %v417_v3 = vpack.c.bf16 (!%p142_p9), %v175_v1, %v174_v0  ;;  %v177_v4 = vld [vmem:[%s731_s1 + $0x18] sm:$0xff] (!%p142_p9)  ;;  %p166_p10 = scmp.lt.s32.totalorder (!%p142_p9), %s355_s30, 3  ;;  %v178_v6 = vld [vmem:[%s731_s1 + $0x20] sm:$0xff] (!%p142_p9)  ;;  %v179_v7 = vld [vmem:[%s731_s1 + $0x28] sm:$0xff] (!%p142_p9) }
   0xf   : > { %v421_v5 = vpack.c.bf16 (!%p142_p9), %v177_v4, %v176_v2  ;;  %v425_v8 = vpack.c.bf16 (!%p142_p9), %v179_v7, %v178_v6  ;;  %v180_v9 = vld [vmem:[%s731_s1 + $0x30] sm:$0xff] (!%p142_p9)  ;;  %v181_v10 = vld [vmem:[%s731_s1 + $0x38] sm:$0xff] (!%p142_p9)  ;;  %v182_v13 = vld [vmem:[%s731_s1 + $0x40] sm:$0xff] (!%p142_p9)  ;;  %s354_s27 = sshll.u32 (!%p142_p9), %s162_s25, 4  ;;  %s363_s5 = sshll.u32 (!%p142_p9), %s598_s16, 8 }
  0x10   : > { %418 = vmatprep.subr.bf16.mxu0 (!%p142_p9), %v417_v3  ;;  %v429_v12 = vpack.c.bf16 (!%p142_p9), %v181_v10, %v180_v9  ;;  %v183_v14 = vld [vmem:[%s731_s1 + $0x48] sm:$0xff] (!%p142_p9)  ;;  %v184_v16 = vld [vmem:[%s731_s1 + $0x50] sm:$0xff] (!%p142_p9)  ;;  %v185_v17 = vld [vmem:[%s731_s1 + $0x58] sm:$0xff] (!%p142_p9)  ;;  %s687_s7 = scalar_lea.hbm (!%p142_p9), %s733_s3, %s363_s5  ;;  %s689_s8 = scalar_lea.sflag (!%p142_p9), [#allocation3], %s162_s25 }
  0x11   : > { %420 = vmatpush3.bf16.msra.mxu0 (!%p142_p9), %v417_v3  ;;  %v433_v15 = vpack.c.bf16 (!%p142_p9), %v183_v14, %v182_v13  ;;  %v437_v18 = vpack.c.bf16 (!%p142_p9), %v185_v17, %v184_v16  ;;  %v186_v19 = vld [vmem:[%s731_s1 + $0x60] sm:$0xff] (!%p142_p9)  ;;  %v187_v20 = vld [vmem:[%s731_s1 + $0x68] sm:$0xff] (!%p142_p9)  ;;  %v188_v22 = vld [vmem:[%s731_s1 + $0x70] sm:$0xff] (!%p142_p9)  ;;  %s554_s16 = smov (!%p142_p9), [#allocation2]  }
  0x12   : > { %422 = vmatprep.subr.bf16.mxu0 (!%p142_p9), %v421_v5  ;;  %v441_v21 = vpack.c.bf16 (!%p142_p9), %v187_v20, %v186_v19  ;;  %v189_v23 = vld [vmem:[%s731_s1 + $0x78] sm:$0xff] (!%p142_p9)  ;;  %v357_v26 = vld [vmem:[%s732_s2] ss:$0 sm:$0xff] (!%p142_p9) }
  0x13   : > { %v445_v24 = vpack.c.bf16 (!%p142_p9), %v189_v23, %v188_v22 }
  0x15   : > { %s741_s30 = smov (!%p166_p10, %s355_s30), 3  ;;  %424 = vmatpush3.bf16.msra.mxu0 %v421_v5 }
  0x16   : > { %s356_s10 = sshll.u32 %s741_s30, 3  ;;  %426 = vmatprep.subr.bf16.mxu0 %v425_v8  ;;  %s164_s30 = scalar_lea.vmem [#allocation2], %s354_s27 }
  0x17   : > { %s169_s26 = scalar_lea.vmem %s730_s0, %s356_s10  ;;  %s288_s4 = sshll.u32 %s164_s30, 4  ;;  %s682_s4 = int_to_ptr.vmem [resolvable:$true] %s288_s4 }
  0x18   : > { %v172_v11 = vld [vmem:[%s169_s26] sm:$0xff]  ;;  %v173_v25 = vld [vmem:[%s169_s26 + $0x8] sm:$0xff]  ;;  %s490_s9 = scalar_lea.vmem %s682_s4, 256  ;;  %s494_s10 = sshll.u32 %s554_s16, 4  ;;  %s495_s10 = int_to_ptr.vmem [resolvable:$false] %s494_s10 }
  0x19   : > { %414 = vmatprep.mubr.f32.mxu0 %v172_v11  ;;  %428 = vmatpush3.bf16.msra.mxu0 %v425_v8  ;;  %p491_p11 = scmp.ne.s32.totalorder %s682_s4, %s490_s9  ;;  %s496_s11 = scalar_lea.vmem %s495_s10, 512 }
  0x1a   : > { %430 = vmatprep.subr.bf16.mxu0 %v429_v12  ;;  %p497_p0 = scmp.lt.s32.totalorder %s682_s4, %s495_s10  ;;  %p498_p1 = scmp.lt.s32.totalorder %s496_s11, %s490_s9 }
  0x1b   : > { %p492_p12 = pnand %p491_p11, %p615_p5 }
  0x1c   : > { %p499_p2 = por %p498_p1, %p497_p0 }
  0x1d   : > { %432 = vmatpush3.bf16.msra.mxu0 %v429_v12  ;;  %p493_p13 = pneg %p492_p12 }
  0x1e   : > { %434 = vmatprep.subr.bf16.mxu0 %v433_v15 }
  0x1f   : > { %p500_p3 = pnand %p499_p2, %p493_p13 }
  0x21   : > { %436 = vmatpush3.bf16.msra.mxu0 %v433_v15 }
  0x22   : > { %438 = vmatprep.subr.bf16.mxu0 %v437_v18 }
  0x25   : > { %440 = vmatpush3.bf16.msra.mxu0 %v437_v18 }
  0x26   : > { %442 = vmatprep.subr.bf16.mxu0 %v441_v21 }
  0x29   : > { %444 = vmatpush3.bf16.msra.mxu0 %v441_v21 }
  0x2a   : > { %446 = vmatprep.subr.bf16.mxu0 %v445_v24 }
  0x2d   : > { %448 = vmatpush3.bf16.msra.mxu0 %v445_v24 }
  0x30   : > { %415 = vmatmul.mubr.f32.vlgmr.msra.gmra.mrb[0].mxu0 %v173_v25 }
 0x103   : > { %v416_v27 = vpop.f32.mrb[0].mxu0 }
 0x104   : > { %v269_v28 = vadd.f32 %v416_v27, %v357_v26  ;;  %v263_v29 = vpop.f32.mrb[1].mxu0 }
 0x105   : > { %v264_v30 = vadd.f32 %v357_v26, %v263_v29 }
 0x106   : > { %273 = vst [vmem:[%s164_s30 + $0x8] sm:$0xff] %v269_v28 }
 0x107   : > { %272 = vst [vmem:[%s164_s30] sm:$0xff] %v264_v30 }
 0x108   : > { %503 = shalt.err (!%p500_p3)
}
 0x109   : > { %s504_s17 = scalar_lea.hbm %s687_s7, 256  ;;  %s508_s24 = scalar_lea.hbm %s733_s3, 512 }
 0x10a   : > { %p505_p4 = scmp.ne.s32.totalorder %s687_s7, %s504_s17  ;;  %p509_p9 = scmp.lt.u32.totalorder %s687_s7, %s733_s3 }
 0x10b   : > { %p510_p10 = scmp.lt.u32.totalorder %s508_s24, %s504_s17  ;;  %p512_p12 = scmp.lt.u32.totalorder %s504_s17, %s687_s7 }
 0x10c   : > { %p506_p7 = pnand %p505_p4, %p615_p5 }
 0x10d   : > { %p511_p11 = por %p510_p10, %p509_p9 }
 0x10e   : > { %p507_p8 = pneg %p506_p7 }
 0x10f   : > { %p513_p13 = por %p512_p12, %p511_p11 }
 0x111   : > { %p514_p0 = pnand %p513_p13, %p507_p8 }
 0x113   : > { %517 = shalt.err (!%p514_p0)
}
 0x114   : > { %s555_s28 = smov 128   ;;  %s556_s29 = smov 8  }
 0x115   : > { %449 = dma.vmem_to_hbm [thread:$0]  (%p615_p5), %s682_s4, 256, %s687_s7, %s689_s8, %s555_s28, %s555_s28, %s556_s29  }
 0x116 PF: > { %p455_p1 = scmp.ge.s32.totalorder %s552_s15, 2  ;;  %s303_s30 = sand.u32 1, %s540_s12  }
 0x117   : > { %s304_s5 = scalar_lea.sflag [#allocation3], %s303_s30 }
 0x118   : > { %p452_p2 = pnand %p455_p1, %p619_p6 }
 0x11a   : > { %535 = dma.done.wait (!%p452_p2), %s304_s5, 256  }
 0x11b   : > { %537 = vsyncadd (!%p452_p2), %s304_s5, 4294967040  ;;  %p13_p3 = scmp.ge.s32.totalorder %s602_s18, 4   ;;  %s736_s12 = smov %s544_s13 }
 0x11c   : > { %s737_s13 = smov %s548_s14  ;;  %s738_s14 = smov %s613_s21 }
 0x11d   : > { %s739_s15 = smov %s602_s18  ;;  %15 = sbr.rel (!%p13_p3) target bundleno = 3 (0x3), region = 67 }
 0x124   :  { %309 = vsyncpa [#allocation3], 1 }
 0x125   :  { %311 = vsyncpa [#allocation3 + $0x1], 1 }

</bundles_post_ra>
